<compile_context>
chip_gen: v5e
topology: v5e:2x2
jax: 0.10.0
libtpu: 0.0.40
codegen_flags: <defaults>
</compile_context>

<pallas_src>
import functools

import jax
import jax.numpy as jnp
from jax import lax
from jax.experimental import pallas as pl
from jax.experimental.pallas import tpu as pltpu


def _round_up(n, m):
    return ((n + m - 1) // m) * m


def _fused_mlp_kernel(x_ref, *refs, num_layers: int, dout_final: int, chunk: int):
    """Fused (matmul + bias + ReLU) chain over one batch tile.

    refs = (w1, b1, ..., wL, bL, out). Weights are bf16 (Din_p, Dout_p)
    zero-padded to 128-lane multiples; biases are f32 (1, Dout_p). The final
    result is sliced back to dout_final columns before the store so the HBM
    writeback carries no zero padding.
    """
    o_ref = refs[-1]
    wb = refs[:-1]
    tb = x_ref.shape[0]
    n_chunks = tb // chunk

    def compute_chunk(r):
        h = x_ref[pl.ds(r, chunk), :].astype(jnp.bfloat16)
        for l in range(num_layers):
            w = wb[2 * l][...]          # bf16, padded
            b = wb[2 * l + 1][...]      # f32, padded
            acc = jnp.dot(h, w, preferred_element_type=jnp.float32) + b
            if l != num_layers - 1:     # no activation on the final layer
                h = jnp.maximum(acc, 0.0).astype(jnp.bfloat16)
            else:
                h = acc                 # f32
        o_ref[pl.ds(r, chunk), :] = h[:, :dout_final].astype(o_ref.dtype)

    if n_chunks == 1:
        compute_chunk(0)
    else:
        def body(c, carry):
            r = pl.multiple_of(c * chunk, chunk)
            compute_chunk(r)
            return carry
        lax.fori_loop(0, n_chunks, body, 0, unroll=True)


def prepare_mlp_params(params):
    """Zero-pad every layer width to a multiple of 128 and cast W to bf16.

    params: list of (W (din, dout) f32, b (1, dout) f32) at true sizes.
    Returns (prepared_params, dout_final). Padding with zeros + ReLU(0)=0
    keeps numerics identical to the unpadded model.
    """
    prepared = []
    prev_out_p = params[0][0].shape[0]  # x's true feature dim (not padded)
    for (w, b) in params:
        din, dout = w.shape
        din_p = prev_out_p
        dout_p = max(128, _round_up(dout, 128))
        w_p = jnp.zeros((din_p, dout_p), jnp.float32).at[:din, :dout].set(
            w.astype(jnp.float32))
        b_p = jnp.zeros((1, dout_p), jnp.float32).at[:, :dout].set(
            b.astype(jnp.float32).reshape(1, -1))
        prepared.append((w_p.astype(jnp.bfloat16), b_p))
        prev_out_p = dout_p
    return prepared, params[-1][0].shape[1]


def _choose_batch_tile(B, *, cap=2048, chunk=256):
    b8 = _round_up(B, 8)
    if b8 < 16:
        return b8
    # Aim for >= 2 grid steps so v7x's second TensorCore gets work.
    tb = _round_up((b8 + 1) // 2, 8)
    if tb > chunk:
        tb = _round_up(tb, chunk)  # keep the in-kernel chunk loop exact
    return min(tb, cap)


def mlp_fused(x, prepared_params, dout_final, *, tb=None, chunk=256):
    """x: (B, Din) f32; prepared_params from prepare_mlp_params. -> (B, dout_final)."""
    B, Din = x.shape
    num_layers = len(prepared_params)
    assert prepared_params[0][0].shape[0] == Din

    if tb is None:
        tb = _choose_batch_tile(B, chunk=chunk)
    chunk = min(chunk, tb)
    grid = (pl.cdiv(B, tb),)

    flat_inputs = []
    in_specs = [pl.BlockSpec((tb, Din), lambda i: (i, 0))]
    for w, b in prepared_params:
        flat_inputs.extend([w, b])
        in_specs.append(pl.BlockSpec(w.shape, lambda i: (0, 0)))
        in_specs.append(pl.BlockSpec(b.shape, lambda i: (0, 0)))

    # Advisory cost estimate (padded FLOPs, true HBM bytes).
    flops = 0
    bytes_accessed = x.size * x.dtype.itemsize + B * dout_final * x.dtype.itemsize
    for w, b in prepared_params:
        flops += 2 * B * w.shape[0] * w.shape[1]
        bytes_accessed += w.size * w.dtype.itemsize + b.size * b.dtype.itemsize

    kernel = functools.partial(
        _fused_mlp_kernel, num_layers=num_layers,
        dout_final=dout_final, chunk=chunk)

    return pl.pallas_call(
        kernel,
        out_shape=jax.ShapeDtypeStruct((B, dout_final), x.dtype),
        grid=grid,
        in_specs=in_specs,
        out_specs=pl.BlockSpec((tb, dout_final), lambda i: (i, 0)),
        compiler_params=pltpu.CompilerParams(
            dimension_semantics=("parallel",),
            vmem_limit_bytes=32 * 1024 * 1024,
        ),
        cost_estimate=pl.CostEstimate(
            flops=flops, transcendentals=0, bytes_accessed=bytes_accessed),
    )(x, *flat_inputs)


def init_mlp_params(layer_sizes, seed=0, dtype=jnp.float32):
    """Deterministic init mirroring nn.Linear shapes, stored transposed (in, out)."""
    params = []
    key = jax.random.PRNGKey(seed)
    for din, dout in zip(layer_sizes[:-1], layer_sizes[1:]):
        key, kw, kb = jax.random.split(key, 3)
        bound = 1.0 / (din ** 0.5)  # nn.Linear default uniform bound
        w = jax.random.uniform(kw, (din, dout), dtype, minval=-bound, maxval=bound)
        b = jax.random.uniform(kb, (1, dout), dtype, minval=-bound, maxval=bound)
        params.append((w, b))
    return params


def mlp_forward(args, prepared_params, dout_final):
    """Mirrors MLP.forward: takes (_, _, x), applies the fused FC stack, then squeeze."""
    _, _, x = args
    return jnp.squeeze(mlp_fused(x, prepared_params, dout_final))


if __name__ == "__main__":
    layer_sizes = [32, 64, 64, 1]
    batch = 8

    params = init_mlp_params(layer_sizes, seed=0)
    prepared_params, dout_final = prepare_mlp_params(params)

    key = jax.random.PRNGKey(0)
    x = jax.random.normal(key, (batch, layer_sizes[0]), jnp.float32)

    # args tuple matching the torch forward signature: forward((_, _, x))
    args = (None, None, x)

    out = mlp_forward(args, prepared_params, dout_final)
    out = jax.block_until_ready(out)

    # Reference in plain JAX, matching the kernel's bf16-input / f32-accumulate path.
    h = x
    for l, (w, b) in enumerate(params):
        h = jnp.dot(h.astype(jnp.bfloat16), w.astype(jnp.bfloat16),
                    preferred_element_type=jnp.float32) + b
        if l != len(params) - 1:
            h = jnp.maximum(h, 0.0)
    ref = jnp.squeeze(h)

    assert out.shape == (batch,), out.shape
    assert jnp.allclose(out, ref, atol=2e-3, rtol=2e-3), (out, ref)

    print("KERNEL_OK")
</pallas_src>

<mosaic_0001>
module attributes {stable_mosaic.version = 11 : i64} {
  func.func @_fused_mlp_kernel(%arg0: i32, %arg1: memref<8x32xf32, #tpu.memory_space<vmem>>, %arg2: memref<32x128xbf16, #tpu.memory_space<vmem>>, %arg3: memref<1x128xf32, #tpu.memory_space<vmem>>, %arg4: memref<128x128xbf16, #tpu.memory_space<vmem>>, %arg5: memref<1x128xf32, #tpu.memory_space<vmem>>, %arg6: memref<128x128xbf16, #tpu.memory_space<vmem>>, %arg7: memref<1x128xf32, #tpu.memory_space<vmem>>, %arg8: memref<8x1xf32, #tpu.memory_space<vmem>>) attributes {dimension_semantics = [#tpu.dimension_semantics<parallel>], iteration_bounds = array<i64: 1>, scalar_prefetch = 0 : i64, scratch_operands = 0 : i64, tpu.core_type = #tpu.core_type<tc>, window_params = [{transform_indices = @transform_0, window_bounds = array<i64: 8, 32>}, {pipeline_mode = #tpu.pipeline_mode<synchronous>, transform_indices = @transform_1, window_bounds = array<i64: 32, 128>}, {pipeline_mode = #tpu.pipeline_mode<synchronous>, transform_indices = @transform_2, window_bounds = array<i64: 1, 128>}, {pipeline_mode = #tpu.pipeline_mode<synchronous>, transform_indices = @transform_3, window_bounds = array<i64: 128, 128>}, {pipeline_mode = #tpu.pipeline_mode<synchronous>, transform_indices = @transform_4, window_bounds = array<i64: 1, 128>}, {pipeline_mode = #tpu.pipeline_mode<synchronous>, transform_indices = @transform_5, window_bounds = array<i64: 128, 128>}, {pipeline_mode = #tpu.pipeline_mode<synchronous>, transform_indices = @transform_6, window_bounds = array<i64: 1, 128>}, {transform_indices = @transform_7, window_bounds = array<i64: 8, 1>}]} {
    %c0 = arith.constant 0 : index
    %c0_0 = arith.constant 0 : index
    %0 = vector.load %arg1[%c0, %c0_0] : memref<8x32xf32, #tpu.memory_space<vmem>>, vector<8x32xf32>
    %1 = arith.truncf %0 : vector<8x32xf32> to vector<8x32xbf16>
    %c0_1 = arith.constant 0 : index
    %c0_2 = arith.constant 0 : index
    %2 = vector.load %arg2[%c0_1, %c0_2] : memref<32x128xbf16, #tpu.memory_space<vmem>>, vector<32x128xbf16>
    %c0_3 = arith.constant 0 : index
    %c0_4 = arith.constant 0 : index
    %3 = vector.load %arg3[%c0_3, %c0_4] : memref<1x128xf32, #tpu.memory_space<vmem>>, vector<1x128xf32>
    %cst = arith.constant dense<0.000000e+00> : vector<8x128xf32>
    %4 = tpu.matmul %1, %2, %cst {dimension_numbers = #tpu.dot_dimension_numbers<[1], [0], [0], [1], [0, 0, 1, 1], [], []>} : vector<8x32xbf16>, vector<32x128xbf16>, vector<8x128xf32> -> vector<8x128xf32>
    %5 = vector.broadcast %3 : vector<1x128xf32> to vector<8x128xf32>
    %6 = arith.addf %4, %5 : vector<8x128xf32>
    %cst_5 = arith.constant 0.000000e+00 : f32
    %7 = vector.broadcast %cst_5 : f32 to vector<8x128xf32>
    %8 = arith.maximumf %6, %7 : vector<8x128xf32>
    %9 = arith.truncf %8 : vector<8x128xf32> to vector<8x128xbf16>
    %c0_6 = arith.constant 0 : index
    %c0_7 = arith.constant 0 : index
    %10 = vector.load %arg4[%c0_6, %c0_7] : memref<128x128xbf16, #tpu.memory_space<vmem>>, vector<128x128xbf16>
    %c0_8 = arith.constant 0 : index
    %c0_9 = arith.constant 0 : index
    %11 = vector.load %arg5[%c0_8, %c0_9] : memref<1x128xf32, #tpu.memory_space<vmem>>, vector<1x128xf32>
    %cst_10 = arith.constant dense<0.000000e+00> : vector<8x128xf32>
    %12 = tpu.matmul %9, %10, %cst_10 {dimension_numbers = #tpu.dot_dimension_numbers<[1], [0], [0], [1], [0, 0, 1, 1], [], []>} : vector<8x128xbf16>, vector<128x128xbf16>, vector<8x128xf32> -> vector<8x128xf32>
    %13 = vector.broadcast %11 : vector<1x128xf32> to vector<8x128xf32>
    %14 = arith.addf %12, %13 : vector<8x128xf32>
    %cst_11 = arith.constant 0.000000e+00 : f32
    %15 = vector.broadcast %cst_11 : f32 to vector<8x128xf32>
    %16 = arith.maximumf %14, %15 : vector<8x128xf32>
    %17 = arith.truncf %16 : vector<8x128xf32> to vector<8x128xbf16>
    %c0_12 = arith.constant 0 : index
    %c0_13 = arith.constant 0 : index
    %18 = vector.load %arg6[%c0_12, %c0_13] : memref<128x128xbf16, #tpu.memory_space<vmem>>, vector<128x128xbf16>
    %c0_14 = arith.constant 0 : index
    %c0_15 = arith.constant 0 : index
    %19 = vector.load %arg7[%c0_14, %c0_15] : memref<1x128xf32, #tpu.memory_space<vmem>>, vector<1x128xf32>
    %cst_16 = arith.constant dense<0.000000e+00> : vector<8x128xf32>
    %20 = tpu.matmul %17, %18, %cst_16 {dimension_numbers = #tpu.dot_dimension_numbers<[1], [0], [0], [1], [0, 0, 1, 1], [], []>} : vector<8x128xbf16>, vector<128x128xbf16>, vector<8x128xf32> -> vector<8x128xf32>
    %21 = vector.broadcast %19 : vector<1x128xf32> to vector<8x128xf32>
    %22 = arith.addf %20, %21 : vector<8x128xf32>
    %23 = vector.extract_strided_slice %22 {offsets = [0, 0], sizes = [8, 1], strides = [1, 1]} : vector<8x128xf32> to vector<8x1xf32>
    %c0_17 = arith.constant 0 : index
    %c0_18 = arith.constant 0 : index
    %24 = vector.load %arg8[%c0_17, %c0_18] : memref<8x1xf32, #tpu.memory_space<vmem>>, vector<8x1xf32>
    tpu.vector_store %arg8[%c0_17, %c0_18], %23 {strides = array<i32>} : memref<8x1xf32, #tpu.memory_space<vmem>>, vector<8x1xf32>,
    return
  }
  func.func @transform_0(%arg0: i32) -> (i32, i32) {
    %c0_i32 = arith.constant 0 : i32
    %c0_i32_0 = arith.constant 0 : i32
    return %arg0, %c0_i32 : i32, i32
  }
  func.func @transform_1(%arg0: i32) -> (i32, i32) {
    %c0_i32 = arith.constant 0 : i32
    %c0_i32_0 = arith.constant 0 : i32
    %c0_i32_1 = arith.constant 0 : i32
    return %c0_i32, %c0_i32_0 : i32, i32
  }
  func.func @transform_2(%arg0: i32) -> (i32, i32) {
    %c0_i32 = arith.constant 0 : i32
    %c0_i32_0 = arith.constant 0 : i32
    %c0_i32_1 = arith.constant 0 : i32
    return %c0_i32, %c0_i32_0 : i32, i32
  }
  func.func @transform_3(%arg0: i32) -> (i32, i32) {
    %c0_i32 = arith.constant 0 : i32
    %c0_i32_0 = arith.constant 0 : i32
    %c0_i32_1 = arith.constant 0 : i32
    return %c0_i32, %c0_i32_0 : i32, i32
  }
  func.func @transform_4(%arg0: i32) -> (i32, i32) {
    %c0_i32 = arith.constant 0 : i32
    %c0_i32_0 = arith.constant 0 : i32
    %c0_i32_1 = arith.constant 0 : i32
    return %c0_i32, %c0_i32_0 : i32, i32
  }
  func.func @transform_5(%arg0: i32) -> (i32, i32) {
    %c0_i32 = arith.constant 0 : i32
    %c0_i32_0 = arith.constant 0 : i32
    %c0_i32_1 = arith.constant 0 : i32
    return %c0_i32, %c0_i32_0 : i32, i32
  }
  func.func @transform_6(%arg0: i32) -> (i32, i32) {
    %c0_i32 = arith.constant 0 : i32
    %c0_i32_0 = arith.constant 0 : i32
    %c0_i32_1 = arith.constant 0 : i32
    return %c0_i32, %c0_i32_0 : i32, i32
  }
  func.func @transform_7(%arg0: i32) -> (i32, i32) {
    %c0_i32 = arith.constant 0 : i32
    %c0_i32_0 = arith.constant 0 : i32
    return %arg0, %c0_i32 : i32, i32
  }
}

</mosaic_0001>

<bundles_post_ra>
// kernel: tpu_custom_call.1
= control target key start
LH: loop header
LB: loop body
LE: loop exit
PB: predicated region body
PF: predicated region fallthrough
CT: control target
= control target key end

     0   :  { %12 = vsyncpa [#allocation3], 0  ;;  %s574_s0 = inlined_call_operand.hbm [shape: f32[8,32], index: 0, kind: input, shape index: {}]   ;;  %s575_s1 = inlined_call_operand.hbm [shape: bf16[32,128], index: 1, kind: input, shape index: {}]   ;;  %s576_s2 = inlined_call_operand.vmem [shape: f32[1,128], index: 2, kind: input, shape index: {}]   ;;  %s577_s3 = inlined_call_operand.hbm [shape: bf16[128,128], index: 3, kind: input, shape index: {}]   ;;  %s578_s4 = inlined_call_operand.vmem [shape: f32[1,128], index: 4, kind: input, shape index: {}]   ;;  %s579_s5 = inlined_call_operand.hbm [shape: bf16[128,128], index: 5, kind: input, shape index: {}]   ;;  %s580_s6 = inlined_call_operand.vmem [shape: f32[1,128], index: 6, kind: input, shape index: {}]   ;;  %s581_s7 = inlined_call_operand.vmem [shape: f32[8,1], index: 7, kind: output, shape index: {}]  }
   0x1   :  { %13 = vsyncpa [#allocation5], 0  ;;  %s30_s26 = sshll.u32 %s575_s1, 4  ;;  %s31_s26 = int_to_ptr.hbm [resolvable:$true] %s30_s26 }
   0x2   :  { %14 = vsyncpa [#allocation8], 0  ;;  %s504_s27 = smov [#allocation4]   ;;  %s20_s8 = sshll.u32 %s574_s0, 4  ;;  %s21_s8 = int_to_ptr.hbm [resolvable:$true] %s20_s8 }
   0x3   :  { %s32_s28 = sshll.u32 %s504_s27, 4  ;;  %s505_s9 = smov 64   ;;  %s33_s28 = int_to_ptr.vmem [resolvable:$true] %s32_s28 }
   0x4   :  { %s506_s10 = smov 4   ;;  %s507_s11 = smov [#allocation2]  }
   0x5   :  { %38 = dma.hbm_to_vmem [thread:$0]  %s31_s26, 256, %s33_s28, [#allocation5], %s505_s9, %s505_s9, %s506_s10  }
   0x6   :  { %s22_s12 = sshll.u32 %s507_s11, 4  ;;  %s45_s15 = sshll.u32 %s577_s3, 4  ;;  %s23_s12 = int_to_ptr.vmem [resolvable:$true] %s22_s12  ;;  %s46_s15 = int_to_ptr.hbm [resolvable:$true] %s45_s15 }
   0x7   :  { %25 = dma.hbm_to_vmem [thread:$0]  %s21_s8, 128, %s23_s12, [#allocation3]  }
   0x8   :  { %s60_s17 = sshll.u32 %s579_s5, 4  ;;  %s508_s18 = smov [#allocation6]   ;;  %s61_s17 = int_to_ptr.hbm [resolvable:$true] %s60_s17 }
   0x9   :  { %s47_s19 = sshll.u32 %s508_s18, 4  ;;  %s509_s0 = smov [#allocation7]   ;;  %s48_s19 = int_to_ptr.vmem [resolvable:$true] %s47_s19 }
   0xa   :  { %53 = dma.hbm_to_vmem [thread:$0]  %s46_s15, 1024, %s48_s19, [#allocation5], %s505_s9, %s505_s9, %s506_s10  }
   0xb   :  { %s62_s20 = sshll.u32 %s509_s0, 4  ;;  %s63_s20 = int_to_ptr.vmem [resolvable:$true] %s62_s20 }
   0xc   :  { %68 = dma.hbm_to_vmem [thread:$0]  %s61_s17, 1024, %s63_s20, [#allocation8], %s505_s9, %s505_s9, %s506_s10  }
   0xd   :  { %498 = dma.done.wait [#allocation3], 128  }
   0xe   :  { %499 = vsyncadd [#allocation3], 4294967168 }
   0xf   :  { %500 = dma.done.wait [#allocation5], 1280  }
  0x10   :  { %501 = vsyncadd [#allocation5], 4294966016 }
  0x11   :  { %502 = dma.done.wait [#allocation8], 1024  }
  0x12   :  { %503 = vsyncadd [#allocation8], 4294966272  ;;  %v376_v0 = vld [vmem:[#allocation4 + $0x8] sm:$0xff]  ;;  %v375_v2 = vld [vmem:[#allocation4] sm:$0xff]  ;;  %vm110_vm0 = vcmask 261120   ;;  %vm293_vm1 = vcmask 7168  }
  0x13   :  { %v384_v1 = vld [vmem:[#allocation6 + $0x38] sm:$0xff]  ;;  %120 = vmatpush.bf16.msra.mxu0 %v376_v0  ;;  %v88_v3 = vld [vmem:[#allocation2] sm:$0xff]  ;;  %v383_v4 = vld [vmem:[#allocation6 + $0x30] sm:$0xff] }
  0x14   :  { %197 = vmatpush.bf16.msra.mxu1 %v384_v1  ;;  %v89_v5 = vpack.c.bf16 %v88_v3, %v88_v3  ;;  %v382_v6 = vld [vmem:[#allocation6 + $0x28] sm:$0xff]  ;;  %v381_v7 = vld [vmem:[#allocation6 + $0x20] sm:$0xff]  ;;  %v380_v8 = vld [vmem:[#allocation6 + $0x18] sm:$0xff] }
  0x15   :  { %v379_v9 = vld [vmem:[#allocation6 + $0x10] sm:$0xff]  ;;  %v378_v10 = vld [vmem:[#allocation6 + $0x8] sm:$0xff]  ;;  %v377_v11 = vld [vmem:[#allocation6] sm:$0xff] }
  0x16   :  { %v392_v12 = vld [vmem:[#allocation7 + $0x38] sm:$0xff]  ;;  %v391_v13 = vld [vmem:[#allocation7 + $0x30] sm:$0xff]  ;;  %v390_v14 = vld [vmem:[#allocation7 + $0x28] sm:$0xff] }
  0x17   :  { %121 = vmatpush.bf16.msra.mxu0 %v375_v2  ;;  %280 = vmatpush.bf16.msra.mxu2 %v392_v12  ;;  %v389_v15 = vld [vmem:[#allocation7 + $0x20] sm:$0xff]  ;;  %v388_v16 = vld [vmem:[#allocation7 + $0x18] sm:$0xff]  ;;  %v387_v17 = vld [vmem:[#allocation7 + $0x10] sm:$0xff] }
  0x18   :  { %198 = vmatpush.bf16.msra.mxu1 %v383_v4  ;;  %v399_v18 = vld [vmem:[%s576_s2] ss:$0 sm:$0xff]  ;;  %v385_v25 = vld [vmem:[#allocation7] sm:$0xff] }
  0x19   :  { %v386_v24 = vld [vmem:[#allocation7 + $0x8] sm:$0xff] }
  0x1a   :  { %310 = vmatmul.msk.bf16.vlgmr.msra.gmra.mxu0 %vm110_vm0, %v89_v5  ;;  %v400_v26 = vld [vmem:[%s578_s4] ss:$0 sm:$0xff] }
  0x1b   :  { %281 = vmatpush.bf16.msra.mxu2 %v391_v13  ;;  %v401_v32 = vld [vmem:[%s580_s6] ss:$0 sm:$0xff] }
  0x1c   :  { %199 = vmatpush.bf16.msra.mxu1 %v382_v6 }
  0x1f   :  { %282 = vmatpush.bf16.msra.mxu2 %v390_v14 }
  0x20   :  { %200 = vmatpush.bf16.msra.mxu1 %v381_v7 }
  0x23   :  { %283 = vmatpush.bf16.msra.mxu2 %v389_v15 }
  0x24   :  { %201 = vmatpush.bf16.msra.mxu1 %v380_v8 }
  0x27   :  { %284 = vmatpush.bf16.msra.mxu2 %v388_v16 }
  0x28   :  { %202 = vmatpush.bf16.msra.mxu1 %v379_v9 }
  0x2b   :  { %285 = vmatpush.bf16.msra.mxu2 %v387_v17 }
  0x2c   :  { %203 = vmatpush.bf16.msra.mxu1 %v378_v10 }
  0x2f   :  { %286 = vmatpush.bf16.msra.mxu2 %v386_v24 }
  0x30   :  { %204 = vmatpush.bf16.msra.mxu1 %v377_v11 }
  0x33   :  { %287 = vmatpush.bf16.msra.mxu2 %v385_v25 }
  0x97   :  { %v123_v19 = vpop.f32.mrf.mxu0 }
  0x98   :  { %v124_v20 = vadd.f32 %v399_v18, %v123_v19 }
  0x9a   :  { %v127_v21 = vmax.f32 %v124_v20, 0.0 }
  0x9c   :  { %v128_v22 = vpack.c.bf16 %v127_v21, %v127_v21 }
  0x9e   :  { %205 = vmatmul.bf16.vlgmr.msra.gmra.mxu1 %v128_v22 }
  0x9f   :  { %v125_v23 = vpop.f32.mrf.mxu0 }
 0x11b   :  { %v206_v27 = vpop.f32.mrf.mxu1 }
 0x11c   :  { %v207_v28 = vadd.f32 %v400_v26, %v206_v27 }
 0x11e   :  { %v210_v29 = vmax.f32 %v207_v28, 0.0 }
 0x120   :  { %v211_v30 = vpack.c.bf16 %v210_v29, %v210_v29 }
 0x122   :  { %288 = vmatmul.bf16.vlgmr.msra.gmra.mxu2 %v211_v30 }
 0x123   :  { %v208_v31 = vpop.f32.mrf.mxu1 }
 0x1a5   :  { %v289_v33 = vpop.f32.mrf.mxu2 }
 0x1a6   :  { %v290_v34 = vadd.f32 %v401_v32, %v289_v33 }
 0x1a8   :  { %294 = vst.msk [vmem:[%s581_s7] sm:$0xff] %vm293_vm1, %v290_v34 }
 0x1ad   :  { %v291_v35 = vpop.f32.mrf.mxu2 }
 0x1ae   :  { %299 = vsyncpa [#allocation3], 1 }
 0x1af   :  { %300 = vsyncpa [#allocation5], 1 }
 0x1b0   :  { %301 = vsyncpa [#allocation8], 1 }

</bundles_post_ra>
